<compile_context>
chip_gen: v7x
topology: tpu7x:2x2x1
jax: 0.10.0
libtpu: 0.0.40
codegen_flags: <defaults>
</compile_context>

<pallas_src>
import functools

import jax
import jax.numpy as jnp
from jax.experimental import pallas as pl
from jax.experimental.pallas import tpu as pltpu

IN_FEATURES = 2
HIDDEN = 50
OUT_FEATURES = 4

DEFAULT_TILE_B = 32768  # rows per grid step in the lane-dense layout


def _round_up(n, m):
    return ((n + m - 1) // m) * m


def _vmem_limit_bytes():
    """Generation-aware scoped-VMEM budget (safe on v5e/v6e/v7x)."""
    try:
        cap = int(pltpu.get_tpu_info().vmem_capacity_bytes)
    except Exception:
        cap = 64 * 1024 * 1024  # conservative fallback (v7x physical size)
    return min((cap * 3) // 4, 96 * 1024 * 1024)


_VMEM_LIMIT_BYTES = _vmem_limit_bytes()


def _pick_tile(batch, tile_b):
    """Pick the lane-axis (batch) tile size.

    - Small batches: a single full-extent block (allowed: block == array dims).
    - Larger batches: a multiple of 128 lanes, capped at tile_b, shrunk so the
      grid has >= 2 steps (lets ("parallel",) use both v7x TensorCores).
    """
    if batch <= 2 * 128:
        return batch
    tb = _round_up(min(tile_b, _round_up(batch, 128)), 128)
    if pl.cdiv(batch, tb) < 2:
        tb = max(128, _round_up(pl.cdiv(batch, 2), 128))
    return tb


def _mlp_kernel(x_ref, w1_ref, b1_ref, w2_ref, b2_ref, o_ref):
    # x: (2, TB) lane-dense, w1: (50, 2), b1: (50, 1), w2: (4, 50), b2: (4, 1)
    # fc1 on the MXU: (50, 2) @ (2, TB) -> (50, TB), f32 accumulation.
    h = jnp.dot(w1_ref[...], x_ref[...], preferred_element_type=jnp.float32)
    h = jnp.maximum(h + b1_ref[...], 0.0)  # bias + ReLU on the VPU
    # fc2 on the MXU: (4, 50) @ (50, TB) -> (4, TB).
    y = jnp.dot(w2_ref[...], h, preferred_element_type=jnp.float32) + b2_ref[...]
    o_ref[...] = y.astype(o_ref.dtype)


def mlp_forward_t(xt, w1, b1, w2, b2, *, tile_b=DEFAULT_TILE_B):
    """Lane-dense core: xt is (2, B) f32, returns (4, B) f32.

    Weights use the PyTorch layout: w1 (50, 2), b1 (50,), w2 (4, 50), b2 (4,).
    Use this entry point directly if the surrounding pipeline already keeps
    activations in the transposed (features, batch) layout.
    """
    _, batch = xt.shape
    b1c = b1.reshape(HIDDEN, 1)
    b2c = b2.reshape(OUT_FEATURES, 1)

    tb = _pick_tile(batch, tile_b)
    grid = (pl.cdiv(batch, tb),)  # ragged last tile is masked by Pallas

    flops = 2 * batch * (IN_FEATURES * HIDDEN + HIDDEN * OUT_FEATURES)
    bytes_accessed = 4 * (
        batch * (IN_FEATURES + OUT_FEATURES)
        + HIDDEN * (IN_FEATURES + 1)
        + OUT_FEATURES * (HIDDEN + 1)
    )

    return pl.pallas_call(
        _mlp_kernel,
        out_shape=jax.ShapeDtypeStruct((OUT_FEATURES, batch), jnp.float32),
        grid=grid,
        in_specs=[
            pl.BlockSpec((IN_FEATURES, tb), lambda i: (0, i)),       # x tile
            pl.BlockSpec((HIDDEN, IN_FEATURES), lambda i: (0, 0)),   # w1 (resident)
            pl.BlockSpec((HIDDEN, 1), lambda i: (0, 0)),             # b1 (resident)
            pl.BlockSpec((OUT_FEATURES, HIDDEN), lambda i: (0, 0)),  # w2 (resident)
            pl.BlockSpec((OUT_FEATURES, 1), lambda i: (0, 0)),       # b2 (resident)
        ],
        out_specs=pl.BlockSpec((OUT_FEATURES, tb), lambda i: (0, i)),
        compiler_params=pltpu.CompilerParams(
            dimension_semantics=("parallel",),      # megacore sharding on v7x
            vmem_limit_bytes=_VMEM_LIMIT_BYTES,     # generation-aware budget
        ),
        cost_estimate=pl.CostEstimate(
            flops=flops, transcendentals=0, bytes_accessed=bytes_accessed),
    )(xt, w1, b1c, w2, b2c)


@functools.partial(jax.jit, static_argnames=("tile_b",))
def mlp_forward(x, w1, b1, w2, b2, *, tile_b=DEFAULT_TILE_B):
    """PyTorch-convention entry point: x (B, 2) f32 -> (B, 4) f32.

    Wrapper-side transposes present a lane-dense slab to the kernel (layout
    plumbing only); for best end-to-end efficiency keep the whole pipeline in
    the transposed layout and call mlp_forward_t directly.
    """
    out_t = mlp_forward_t(x.T, w1, b1, w2, b2, tile_b=tile_b)
    return out_t.T


def init_params(key):
    """PyTorch Linear default init: U[-1/sqrt(fan_in), 1/sqrt(fan_in)].

    Weights are stored in PyTorch's (out_features, in_features) layout.
    """
    k1, k2, k3, k4 = jax.random.split(key, 4)
    bound1 = 1.0 / jnp.sqrt(2.0)   # fan_in of fc1 = 2
    bound2 = 1.0 / jnp.sqrt(50.0)  # fan_in of fc2 = 50
    w1 = jax.random.uniform(k1, (HIDDEN, IN_FEATURES), jnp.float32, -bound1, bound1)
    b1 = jax.random.uniform(k2, (HIDDEN,), jnp.float32, -bound1, bound1)
    w2 = jax.random.uniform(k3, (OUT_FEATURES, HIDDEN), jnp.float32, -bound2, bound2)
    b2 = jax.random.uniform(k4, (OUT_FEATURES,), jnp.float32, -bound2, bound2)
    return w1, b1, w2, b2


def _reference(x, w1, b1, w2, b2):
    return jnp.maximum(x @ w1.T + b1, 0.0) @ w2.T + b2


if __name__ == "__main__":
    key = jax.random.PRNGKey(0)
    kx1, kx2, kp = jax.random.split(key, 3)
    w1, b1, w2, b2 = init_params(kp)

    # Case 1: small batch -> single full-extent block.
    batch1 = 64
    x1 = jax.random.normal(kx1, (batch1, IN_FEATURES), jnp.float32)
    out1 = jax.block_until_ready(mlp_forward(x1, w1, b1, w2, b2))
    ref1 = _reference(x1, w1, b1, w2, b2)
    assert out1.shape == (batch1, OUT_FEATURES)
    assert jnp.allclose(out1, ref1, atol=1e-4, rtol=1e-4), float(
        jnp.max(jnp.abs(out1 - ref1)))

    # Case 2: batch that forces a 2-step grid with a ragged (masked) last tile.
    batch2 = 300
    x2 = jax.random.normal(kx2, (batch2, IN_FEATURES), jnp.float32)
    out2 = jax.block_until_ready(mlp_forward(x2, w1, b1, w2, b2))
    ref2 = _reference(x2, w1, b1, w2, b2)
    assert out2.shape == (batch2, OUT_FEATURES)
    assert jnp.allclose(out2, ref2, atol=1e-4, rtol=1e-4), float(
        jnp.max(jnp.abs(out2 - ref2)))

    print("KERNEL_OK")
</pallas_src>

<mosaic_0001>
module attributes {stable_mosaic.version = 11 : i64} {
  func.func @_mlp_kernel(%arg0: i32, %arg1: memref<2x64xf32, #tpu.memory_space<vmem>>, %arg2: memref<50x2xf32, #tpu.memory_space<vmem>>, %arg3: memref<50x1xf32, #tpu.memory_space<vmem>>, %arg4: memref<4x50xf32, #tpu.memory_space<vmem>>, %arg5: memref<4x1xf32, #tpu.memory_space<vmem>>, %arg6: memref<4x64xf32, #tpu.memory_space<vmem>>) attributes {dimension_semantics = [#tpu.dimension_semantics<parallel>], iteration_bounds = array<i64: 1>, scalar_prefetch = 0 : i64, scratch_operands = 0 : i64, tpu.core_type = #tpu.core_type<tc>, window_params = [{transform_indices = @transform_0, window_bounds = array<i64: 2, 64>}, {pipeline_mode = #tpu.pipeline_mode<synchronous>, transform_indices = @transform_1, window_bounds = array<i64: 50, 2>}, {pipeline_mode = #tpu.pipeline_mode<synchronous>, transform_indices = @transform_2, window_bounds = array<i64: 50, 1>}, {pipeline_mode = #tpu.pipeline_mode<synchronous>, transform_indices = @transform_3, window_bounds = array<i64: 4, 50>}, {pipeline_mode = #tpu.pipeline_mode<synchronous>, transform_indices = @transform_4, window_bounds = array<i64: 4, 1>}, {transform_indices = @transform_5, window_bounds = array<i64: 4, 64>}]} {
    %c0 = arith.constant 0 : index
    %c0_0 = arith.constant 0 : index
    %0 = vector.load %arg2[%c0, %c0_0] : memref<50x2xf32, #tpu.memory_space<vmem>>, vector<50x2xf32>
    %c0_1 = arith.constant 0 : index
    %c0_2 = arith.constant 0 : index
    %1 = vector.load %arg1[%c0_1, %c0_2] : memref<2x64xf32, #tpu.memory_space<vmem>>, vector<2x64xf32>
    %cst = arith.constant dense<0.000000e+00> : vector<50x64xf32>
    %2 = tpu.matmul %0, %1, %cst {dimension_numbers = #tpu.dot_dimension_numbers<[1], [0], [0], [1], [0, 0, 1, 1], [], []>} : vector<50x2xf32>, vector<2x64xf32>, vector<50x64xf32> -> vector<50x64xf32>
    %c0_3 = arith.constant 0 : index
    %c0_4 = arith.constant 0 : index
    %3 = vector.load %arg3[%c0_3, %c0_4] : memref<50x1xf32, #tpu.memory_space<vmem>>, vector<50x1xf32>
    %4 = vector.broadcast %3 : vector<50x1xf32> to vector<50x64xf32>
    %5 = arith.addf %2, %4 : vector<50x64xf32>
    %cst_5 = arith.constant 0.000000e+00 : f32
    %6 = vector.broadcast %cst_5 : f32 to vector<50x64xf32>
    %7 = arith.maximumf %5, %6 : vector<50x64xf32>
    %c0_6 = arith.constant 0 : index
    %c0_7 = arith.constant 0 : index
    %8 = vector.load %arg4[%c0_6, %c0_7] : memref<4x50xf32, #tpu.memory_space<vmem>>, vector<4x50xf32>
    %cst_8 = arith.constant dense<0.000000e+00> : vector<4x64xf32>
    %9 = tpu.matmul %8, %7, %cst_8 {dimension_numbers = #tpu.dot_dimension_numbers<[1], [0], [0], [1], [0, 0, 1, 1], [], []>} : vector<4x50xf32>, vector<50x64xf32>, vector<4x64xf32> -> vector<4x64xf32>
    %c0_9 = arith.constant 0 : index
    %c0_10 = arith.constant 0 : index
    %10 = vector.load %arg5[%c0_9, %c0_10] : memref<4x1xf32, #tpu.memory_space<vmem>>, vector<4x1xf32>
    %11 = vector.broadcast %10 : vector<4x1xf32> to vector<4x64xf32>
    %12 = arith.addf %9, %11 : vector<4x64xf32>
    %c0_11 = arith.constant 0 : index
    %c0_12 = arith.constant 0 : index
    %13 = vector.load %arg6[%c0_11, %c0_12] : memref<4x64xf32, #tpu.memory_space<vmem>>, vector<4x64xf32>
    tpu.vector_store %arg6[%c0_11, %c0_12], %12 {strides = array<i32>} : memref<4x64xf32, #tpu.memory_space<vmem>>, vector<4x64xf32>,
    return
  }
  func.func @transform_0(%arg0: i32) -> (i32, i32) {
    %c0_i32 = arith.constant 0 : i32
    %c0_i32_0 = arith.constant 0 : i32
    return %c0_i32, %arg0 : i32, i32
  }
  func.func @transform_1(%arg0: i32) -> (i32, i32) {
    %c0_i32 = arith.constant 0 : i32
    %c0_i32_0 = arith.constant 0 : i32
    %c0_i32_1 = arith.constant 0 : i32
    return %c0_i32, %c0_i32_0 : i32, i32
  }
  func.func @transform_2(%arg0: i32) -> (i32, i32) {
    %c0_i32 = arith.constant 0 : i32
    %c0_i32_0 = arith.constant 0 : i32
    %c0_i32_1 = arith.constant 0 : i32
    return %c0_i32, %c0_i32_0 : i32, i32
  }
  func.func @transform_3(%arg0: i32) -> (i32, i32) {
    %c0_i32 = arith.constant 0 : i32
    %c0_i32_0 = arith.constant 0 : i32
    %c0_i32_1 = arith.constant 0 : i32
    return %c0_i32, %c0_i32_0 : i32, i32
  }
  func.func @transform_4(%arg0: i32) -> (i32, i32) {
    %c0_i32 = arith.constant 0 : i32
    %c0_i32_0 = arith.constant 0 : i32
    %c0_i32_1 = arith.constant 0 : i32
    return %c0_i32, %c0_i32_0 : i32, i32
  }
  func.func @transform_5(%arg0: i32) -> (i32, i32) {
    %c0_i32 = arith.constant 0 : i32
    %c0_i32_0 = arith.constant 0 : i32
    return %c0_i32, %arg0 : i32, i32
  }
}

</mosaic_0001>

<bundles_post_ra>
// kernel: mlp_forward.1
= control target key start
LH: loop header
LB: loop body
LE: loop exit
PB: predicated region body
PF: predicated region fallthrough
CT: control target
= control target key end

     0   :  { %vm93_vm0 = vcmask 1041408   ;;  %v410_v2 = vmov 0.0   ;;  %vm411_vm1 = vmmov 0   ;;  %vm71_vm2 = vcmask 15360   ;;  %s535_s0 = inlined_call_operand.vmem [shape: f32[2,64], index: 0, kind: input, shape index: {}]   ;;  %s536_s1 = inlined_call_operand.vmem [shape: f32[50,2], index: 1, kind: input, shape index: {}]   ;;  %s537_s2 = inlined_call_operand.vmem [shape: f32[50,1], index: 2, kind: input, shape index: {}]   ;;  %s538_s3 = inlined_call_operand.vmem [shape: f32[4,50], index: 3, kind: input, shape index: {}]   ;;  %s539_s4 = inlined_call_operand.vmem [shape: f32[4,1], index: 4, kind: input, shape index: {}]   ;;  %s540_s5 = inlined_call_operand.hbm [shape: f32[4,64], index: 5, kind: output, shape index: {}]  }
   0x1   :  { %v28_v0 = vld [vmem:[%s535_s0] sm:$0x3]  ;;  %330 = vmatprep.subr.mxu0 %v410_v2  ;;  %332 = vmatprep.mubr.msk.f32.mxu0 %vm411_vm1, %v410_v2  ;;  %v412_v3 = vmov 0   ;;  %v31_v5 = vld [vmem:[%s537_s2 + $0x10] sm:$0xff]  ;;  %v22_v6 = vld [vmem:[%s536_s1 + $0x8] sm:$0xff] }
   0x2   :  { %v21_v1 = vld [vmem:[%s536_s1] sm:$0xff]  ;;  %331 = vmatpush3.msk.msra.mxu0 %vm93_vm0, %v28_v0  ;;  %384 = vset.pattern.permute.xlu0 %v412_v3  ;;  %v30_v7 = vld [vmem:[%s537_s2 + $0x8] sm:$0xff] }
   0x3   :  { %333 = vmatmul.mubr.msk.f32.vlgmr.msra.gmra.mrb[0].mxu0 %vm71_vm2, %v21_v1  ;;  %v29_v4 = vld [vmem:[%s537_s2] sm:$0xff]  ;;  %385 = vset.pattern.permute.xlu1 %v412_v3 }
   0x4   :  { %335 = vmatprep.mubr.msk.f32.mxu0 %vm411_vm1, %v410_v2  ;;  %38 = vperm.xlu0 %384, %v29_v4  }
   0x5   :  { %48 = vperm.xlu1 %385, %v31_v5   ;;  %367 = vmatprep.mubr.msk.f32.mxu1 %vm411_vm1, %v410_v2 }
   0x6   :  { %10 = vsyncpa [#allocation3], 0  ;;  %v32_v8 = vld [vmem:[%s537_s2 + $0x18] sm:$0xff]  ;;  %v23_v9 = vld [vmem:[%s536_s1 + $0x10] sm:$0xff]  ;;  %v413_v18 = vmov 0.0|0.0   ;;  %vm211_vm3 = vcmask 408576  }
   0x7   :  { %336 = vmatmul.mubr.msk.f32.gmra.mrb[2].mxu0 %vm71_vm2, %v22_v6  ;;  %v33_v10 = vld [vmem:[%s537_s2 + $0x20] sm:$0xff]  ;;  %v34_v11 = vld [vmem:[%s537_s2 + $0x28] sm:$0xff]  ;;  %v24_v12 = vld [vmem:[%s536_s1 + $0x18] sm:$0xff]  ;;  %370 = vmatprep.subr.bf16.mxu1 %v413_v18  ;;  %s414_s22 = smov [#allocation2]   ;;  %vm288_vm4 = vcmask 519168  }
   0x8   :  { %338 = vmatprep.mubr.msk.f32.mxu0 %vm411_vm1, %v410_v2  ;;  %43 = vperm.xlu0 %384, %v30_v7   ;;  %v35_v13 = vld [vmem:[%s537_s2 + $0x30] sm:$0x3]  ;;  %v205_v14 = vld [vmem:[%s539_s4] sm:$0xf]  ;;  %v26_v16 = vld [vmem:[%s536_s1 + $0x28] sm:$0xff]  ;;  %s296_s23 = sshll.u32 %s414_s22, 4  ;;  %s297_s23 = int_to_ptr.vmem [resolvable:$true] %s296_s23 }
   0x9   :  { %53 = vperm.xlu1 %385, %v32_v8   ;;  %v25_v15 = vld [vmem:[%s536_s1 + $0x20] sm:$0xff]  ;;  %v27_v17 = vld [vmem:[%s536_s1 + $0x30] sm:$0x3]  ;;  %s386_s24 = scalar_lea.vmem %s297_s23, 64  ;;  %p391_p1 = scmp.lt.s32.totalorder %s297_s23, %s297_s23 }
   0xa   :  { %v204_v57 = vld [vmem:[%s538_s3] sm:$0xf]  ;;  %p387_p0 = scmp.ne.s32.totalorder %s297_s23, %s386_s24  ;;  %p392_p2 = scmp.lt.s32.totalorder %s386_s24, %s386_s24 }
   0xb   :  { %339 = vmatmul.mubr.msk.f32.gmra.mrb[4].mxu0 %vm71_vm2, %v23_v9 }
   0xc   :  { %341 = vmatprep.mubr.msk.f32.mxu0 %vm411_vm1, %v410_v2  ;;  %58 = vperm.xlu0 %384, %v33_v10   ;;  %p393_p3 = por %p392_p2, %p391_p1 }
   0xd   :  { %63 = vperm.xlu1 %385, %v34_v11  }
   0xe   :  { %p394_p4 = pnand %p393_p3, %p387_p0 }
   0xf   :  { %342 = vmatmul.mubr.msk.f32.gmra.mrb[6].mxu0 %vm71_vm2, %v24_v12 }
  0x10   :  { %344 = vmatprep.mubr.msk.f32.mxu0 %vm411_vm1, %v410_v2  ;;  %68 = vperm.xlu0 %384, %v35_v13  }
  0x11   :  { %208 = vperm.xlu1 %385, %v205_v14  }
  0x13   :  { %345 = vmatmul.mubr.msk.f32.gmra.mrb[8].mxu0 %vm71_vm2, %v25_v15 }
  0x14   :  { %347 = vmatprep.mubr.msk.f32.mxu0 %vm411_vm1, %v410_v2 }
  0x17   :  { %348 = vmatmul.mubr.msk.f32.gmra.mrb[10].mxu0 %vm71_vm2, %v26_v16 }
  0x18   :  { %350 = vmatprep.mubr.msk.f32.mxu0 %vm411_vm1, %v410_v2 }
  0x1b   :  { %351 = vmatmul.mubr.msk.f32.gmra.mrb[12].mxu0 %vm71_vm2, %v27_v17 }
  0x83   :  { %v39_v19 = vpop.permute.xlu0 %38 }
  0x84   :  { %v49_v27 = vpop.permute.xlu1 %48 }
  0x87   :  { %v44_v23 = vpop.permute.xlu0 %43 }
  0x88   :  { %v54_v34 = vpop.permute.xlu1 %53 }
  0x8b   :  { %v59_v43 = vpop.permute.xlu0 %58 }
  0x8c   :  { %v64_v45 = vpop.permute.xlu1 %63 }
  0x8f   :  { %v69_v51 = vpop.permute.xlu0 %68 }
  0x90   :  { %v209_v58 = vpop.permute.xlu1 %208 }
  0xd6   :  { %v163_v20 = vpop.f32.mrb[0].mxu0 }
  0xd7   :  { %v334_v21 = vpop.f32.mrb[1].mxu0  ;;  %v164_v22 = vadd.f32 %v163_v20, %v39_v19 }
  0xd9   :  { %v197_v28 = vmax.f32 %v164_v22, 0.0 }
  0xda   :  { %v168_v24 = vpop.f32.mrb[2].mxu0 }
  0xdb   :  { %v169_v25 = vadd.f32 %v168_v24, %v44_v23  ;;  %v337_v26 = vpop.f32.mrb[3].mxu0 }
  0xdd   :  { %v198_v29 = vmax.f32 %v169_v25, 0.0 }
  0xde   :  { %v173_v30 = vpop.f32.mrb[4].mxu0 }
  0xdf   :  { %v340_v31 = vpop.f32.mrb[5].mxu0  ;;  %v371_v32 = vpack.c.bf16 %v198_v29, %v197_v28  ;;  %v174_v33 = vadd.f32 %v173_v30, %v49_v27 }
  0xe1   :  { %372 = vmatpush3.bf16.msra.mxu1 %v371_v32  ;;  %v199_v38 = vmax.f32 %v174_v33, 0.0 }
  0xe2   :  { %v178_v35 = vpop.f32.mrb[6].mxu0  ;;  %373 = vmatprep.subr.bf16.mxu1 %v413_v18 }
  0xe3   :  { %v179_v36 = vadd.f32 %v178_v35, %v54_v34  ;;  %v343_v37 = vpop.f32.mrb[7].mxu0 }
  0xe5   :  { %v200_v39 = vmax.f32 %v179_v36, 0.0 }
  0xe6   :  { %v183_v40 = vpop.f32.mrb[8].mxu0 }
  0xe7   :  { %v374_v41 = vpack.c.bf16 %v200_v39, %v199_v38  ;;  %v346_v42 = vpop.f32.mrb[9].mxu0  ;;  %v184_v44 = vadd.f32 %v183_v40, %v59_v43 }
  0xe9   :  { %375 = vmatpush3.bf16.msra.mxu1 %v374_v41  ;;  %v201_v49 = vmax.f32 %v184_v44, 0.0 }
  0xea   :  { %v188_v46 = vpop.f32.mrb[10].mxu0  ;;  %376 = vmatprep.subr.bf16.mxu1 %v413_v18 }
  0xeb   :  { %v189_v47 = vadd.f32 %v188_v46, %v64_v45  ;;  %v349_v48 = vpop.f32.mrb[11].mxu0 }
  0xed   :  { %v202_v50 = vmax.f32 %v189_v47, 0.0 }
  0xee   :  { %v193_v52 = vpop.f32.mrb[12].mxu0 }
  0xef   :  { %v377_v53 = vpack.c.bf16 %v202_v50, %v201_v49  ;;  %v194_v54 = vadd.f32 %v193_v52, %v69_v51  ;;  %v352_v55 = vpop.f32.mrb[13].mxu0 }
  0xf1   :  { %378 = vmatpush3.bf16.msra.mxu1 %v377_v53  ;;  %v203_v56 = vmax.f32 %v194_v54, 0.0 }
  0xf2   :  { %365 = vmatprep.subr.mxu1 %v410_v2 }
  0xf5   :  { %366 = vmatpush3.msk.msra.mxu1 %vm93_vm0, %v203_v56 }
  0xf6   :  { %368 = vmatmul.mubr.msk.f32.vlgmr.msra.gmra.mrb[0].mxu1 %vm211_vm3, %v204_v57 }
 0x1c9   :  { %v284_v59 = vpop.f32.mrb[0].mxu1 }
 0x1ca   :  { %v285_v60 = vadd.f32 %v284_v59, %v209_v58  ;;  %v369_v61 = vpop.f32.mrb[1].mxu1 }
 0x1cc   :  { %289 = vst.msk [vmem:[#allocation2] sm:$0xf] %vm288_vm4, %v285_v60 }
 0x1cd   :  { %397 = shalt.err (!%p394_p4)
}
 0x1ce   :  { %s398_s26 = scalar_lea.hbm %s540_s5, 64 }
 0x1cf   :  { %p399_p5 = scmp.ne.s32.totalorder %s540_s5, %s398_s26  ;;  %p402_p6 = scmp.lt.u32.totalorder %s398_s26, %s540_s5 }
 0x1d1   :  { %p404_p7 = pnand %p402_p6, %p399_p5 }
 0x1d3   :  { %407 = shalt.err (!%p404_p7)
}
 0x1d4   :  { %299 = dma.vmem_to_hbm [thread:$0]  %s297_s23, 64, %s540_s5, [#allocation3]  }
 0x1d5   :  { %408 = dma.done.wait [#allocation3], 64  }
 0x1d6   :  { %409 = vsyncadd [#allocation3], 4294967232 }
 0x1d7   :  { %303 = vsyncpa [#allocation3], 1 }

</bundles_post_ra>
